<compile_context>
chip_gen: v7x
topology: tpu7x:2x2x1
jax: 0.10.0
libtpu: 0.0.40
codegen_flags: <defaults>
</compile_context>

<pallas_src>
import functools

import jax
import jax.numpy as jnp
from jax.experimental import pallas as pl
from jax.experimental.pallas import tpu as pltpu


# ----------------------------------------------------------------------------
# Pallas kernel: fused (patches @ W + b) projection + LayerNorm(dim).
# ----------------------------------------------------------------------------
def _proj_ln_kernel(p_ref, w_ref, b_ref, g_ref, beta_ref, o_ref, *, eps):
    # p_ref: (row_tile, Kp)   im2col patches (zero-padded along K)
    # w_ref: (Kp, dim)        conv weight reshaped (zero-padded along K)
    # b_ref/g_ref/beta_ref: (1, dim) conv bias / LN gamma / LN beta
    y = jnp.dot(p_ref[...], w_ref[...], preferred_element_type=jnp.float32)
    y = y + b_ref[...].astype(jnp.float32)
    # LayerNorm over the embedding dim (nn.LayerNorm default eps = 1e-5).
    mean = jnp.mean(y, axis=-1, keepdims=True)
    var = jnp.mean((y - mean) ** 2, axis=-1, keepdims=True)
    yn = (y - mean) * jax.lax.rsqrt(var + eps)
    o_ref[...] = (yn * g_ref[...].astype(jnp.float32)
                  + beta_ref[...].astype(jnp.float32)).astype(o_ref.dtype)


def _fused_proj_layernorm(patches2d, w2d, b, gamma, beta, *, row_tile, eps=1e-5):
    M, Kp = patches2d.shape
    dim = w2d.shape[1]
    assert M % row_tile == 0

    itemsize = jnp.dtype(patches2d.dtype).itemsize
    # Double-buffered streamed blocks + resident weight/bias, with headroom.
    block_bytes = itemsize * (2 * row_tile * Kp + 2 * row_tile * dim
                              + Kp * dim + 3 * dim)
    vmem_limit = int(min(max(2 * block_bytes, 32 * 1024 * 1024),
                         48 * 1024 * 1024))

    kern = functools.partial(_proj_ln_kernel, eps=eps)
    return pl.pallas_call(
        kern,
        out_shape=jax.ShapeDtypeStruct((M, dim), patches2d.dtype),
        grid=(M // row_tile,),
        in_specs=[
            pl.BlockSpec((row_tile, Kp), lambda i: (i, 0)),
            pl.BlockSpec((Kp, dim), lambda i: (0, 0)),
            pl.BlockSpec((1, dim), lambda i: (0, 0)),
            pl.BlockSpec((1, dim), lambda i: (0, 0)),
            pl.BlockSpec((1, dim), lambda i: (0, 0)),
        ],
        out_specs=pl.BlockSpec((row_tile, dim), lambda i: (i, 0)),
        compiler_params=pltpu.CompilerParams(
            dimension_semantics=("parallel",),
            vmem_limit_bytes=vmem_limit),
    )(patches2d, w2d, b.reshape(1, dim), gamma.reshape(1, dim),
      beta.reshape(1, dim))


# ----------------------------------------------------------------------------
# Wrapper-side glue: im2col (pure data movement) + row/lane padding.
# ----------------------------------------------------------------------------
def _im2col_3d(x, ps, stride, pad):
    # x: (B, C, D, H, W) -> patches (B, N, C*ps^3); feature order (c, kd, kh, kw)
    # matches PyTorch Conv3d weight (dim, C, kd, kh, kw).reshape(dim, C*ps^3).
    B, C, D, H, W = x.shape
    xp = jnp.pad(x, ((0, 0), (0, 0), (pad, pad), (pad, pad), (pad, pad)))
    Do = (D + 2 * pad - ps) // stride + 1
    Ho = (H + 2 * pad - ps) // stride + 1
    Wo = (W + 2 * pad - ps) // stride + 1
    k = jnp.arange(ps)
    idx_d = jnp.arange(Do)[:, None] * stride + k[None, :]   # (Do, ps)
    idx_h = jnp.arange(Ho)[:, None] * stride + k[None, :]   # (Ho, ps)
    idx_w = jnp.arange(Wo)[:, None] * stride + k[None, :]   # (Wo, ps)
    g = jnp.take(xp, idx_d, axis=2)          # (B, C, Do, ps, Hp, Wp)
    g = jnp.take(g, idx_h, axis=4)           # (B, C, Do, ps, Ho, ps, Wp)
    g = jnp.take(g, idx_w, axis=6)           # (B, C, Do, ps, Ho, ps, Wo, ps)
    g = g.transpose(0, 2, 4, 6, 1, 3, 5, 7)  # (B, Do, Ho, Wo, C, ps, ps, ps)
    patches = g.reshape(B, Do * Ho * Wo, C * ps ** 3)
    return patches, Do, Ho, Wo


def _round_up(v, m):
    return ((v + m - 1) // m) * m


def overlap_patch_embeddings(x, params, *, patch_size, stride, padding,
                             max_row_tile=512):
    """x: (B, in_ch, D, H, W); params = (w, b, gamma, beta) in PyTorch layout."""
    w, b, gamma, beta = params            # w: (dim, in_ch, ps, ps, ps)
    B, C, D, H, W = x.shape
    dim = w.shape[0]
    ps = patch_size

    patches, Do, Ho, Wo = _im2col_3d(x, ps, stride, padding)   # (B, N, K)
    N = Do * Ho * Wo
    K = C * ps ** 3
    w2d = w.reshape(dim, K).T                                   # (K, dim)

    # Zero-pad the contraction dim to a multiple of 128 (lane-aligned blocks).
    Kp = _round_up(K, 128)
    if Kp != K:
        patches = jnp.pad(patches, ((0, 0), (0, 0), (0, Kp - K)))
        w2d = jnp.pad(w2d, ((0, Kp - K), (0, 0)))

    # Flatten tokens, pick a large sublane-aligned row tile, pad rows if needed.
    M = B * N
    row_tile = min(max_row_tile, _round_up(M, 8))
    Mp = _round_up(M, row_tile)
    p2d = patches.reshape(M, Kp)
    if Mp != M:
        p2d = jnp.pad(p2d, ((0, Mp - M), (0, 0)))

    out = _fused_proj_layernorm(p2d, w2d, b, gamma, beta, row_tile=row_tile)
    nfx = out[:M].reshape(B, N, dim)
    return nfx, Do, Ho, Wo


# ----------------------------------------------------------------------------
# Pure-JAX reference (uses XLA's conv directly -> independently validates the
# im2col ordering and the LayerNorm) for a correctness check.
# ----------------------------------------------------------------------------
def overlap_patch_embeddings_ref(x, params, *, patch_size, stride, padding):
    w, b, gamma, beta = params
    px = jax.lax.conv_general_dilated(
        x, w, window_strides=(stride,) * 3,
        padding=[(padding, padding)] * 3,
        dimension_numbers=("NCDHW", "OIDHW", "NCDHW"))
    px = px + b[None, :, None, None, None]
    B, dim, Do, Ho, Wo = px.shape
    fx = px.reshape(B, dim, Do * Ho * Wo).transpose(0, 2, 1)
    mean = fx.mean(-1, keepdims=True)
    var = ((fx - mean) ** 2).mean(-1, keepdims=True)
    nfx = (fx - mean) / jnp.sqrt(var + 1e-5) * gamma + beta
    return nfx, Do, Ho, Wo


if __name__ == "__main__":
    # Module defaults: patch_size=7, stride=4, padding=2, in_ch=2.
    # Small test: dim reduced to 128 (lane-dense) and a 16^3 input volume.
    B, in_ch, dim = 2, 2, 128
    D = H = W = 16
    ps, stride, padding = 7, 4, 2

    key = jax.random.PRNGKey(0)
    ks = jax.random.split(key, 5)
    x = jax.random.normal(ks[0], (B, in_ch, D, H, W), jnp.float32)
    # Deterministic synthetic parameters (PyTorch module shapes).
    w = jax.random.normal(ks[1], (dim, in_ch, ps, ps, ps), jnp.float32) * 0.05  # proj.weight
    b = jax.random.normal(ks[2], (dim,), jnp.float32) * 0.1                     # proj.bias
    gamma = 1.0 + 0.1 * jax.random.normal(ks[3], (dim,), jnp.float32)           # norm.weight
    beta = 0.1 * jax.random.normal(ks[4], (dim,), jnp.float32)                  # norm.bias
    params = (w, b, gamma, beta)

    fwd = jax.jit(functools.partial(overlap_patch_embeddings,
                                    patch_size=ps, stride=stride,
                                    padding=padding))
    nfx, Do, Ho, Wo = fwd(x, params)
    nfx = jax.block_until_ready(nfx)
    Do, Ho, Wo = int(Do), int(Ho), int(Wo)

    ref, rDo, rHo, rWo = overlap_patch_embeddings_ref(
        x, params, patch_size=ps, stride=stride, padding=padding)

    assert (Do, Ho, Wo) == (rDo, rHo, rWo) == (4, 4, 4)
    assert nfx.shape == (B, Do * Ho * Wo, dim)
    # Both paths use TPU default (bf16-input) matmul/conv precision, so allow a
    # few 1e-2 of rounding noise; any logic/ordering bug would show up as O(1).
    assert jnp.allclose(nfx, ref, rtol=3e-2, atol=3e-2), "mismatch vs reference"

    print("KERNEL_OK")
</pallas_src>

<mosaic_0001>
module attributes {stable_mosaic.version = 11 : i64} {
  func.func @_proj_ln_kernel(%arg0: i32, %arg1: memref<128x768xf32, #tpu.memory_space<vmem>>, %arg2: memref<768x128xf32, #tpu.memory_space<vmem>>, %arg3: memref<1x128xf32, #tpu.memory_space<vmem>>, %arg4: memref<1x128xf32, #tpu.memory_space<vmem>>, %arg5: memref<1x128xf32, #tpu.memory_space<vmem>>, %arg6: memref<128x128xf32, #tpu.memory_space<vmem>>) attributes {dimension_semantics = [#tpu.dimension_semantics<parallel>], iteration_bounds = array<i64: 1>, scalar_prefetch = 0 : i64, scratch_operands = 0 : i64, tpu.core_type = #tpu.core_type<tc>, window_params = [{transform_indices = @transform_0, window_bounds = array<i64: 128, 768>}, {pipeline_mode = #tpu.pipeline_mode<synchronous>, transform_indices = @transform_1, window_bounds = array<i64: 768, 128>}, {pipeline_mode = #tpu.pipeline_mode<synchronous>, transform_indices = @transform_2, window_bounds = array<i64: 1, 128>}, {pipeline_mode = #tpu.pipeline_mode<synchronous>, transform_indices = @transform_3, window_bounds = array<i64: 1, 128>}, {pipeline_mode = #tpu.pipeline_mode<synchronous>, transform_indices = @transform_4, window_bounds = array<i64: 1, 128>}, {transform_indices = @transform_5, window_bounds = array<i64: 128, 128>}]} {
    %c0 = arith.constant 0 : index
    %c0_0 = arith.constant 0 : index
    %0 = vector.load %arg1[%c0, %c0_0] : memref<128x768xf32, #tpu.memory_space<vmem>>, vector<128x768xf32>
    %c0_1 = arith.constant 0 : index
    %c0_2 = arith.constant 0 : index
    %1 = vector.load %arg2[%c0_1, %c0_2] : memref<768x128xf32, #tpu.memory_space<vmem>>, vector<768x128xf32>
    %cst = arith.constant dense<0.000000e+00> : vector<128x128xf32>
    %2 = tpu.matmul %0, %1, %cst {dimension_numbers = #tpu.dot_dimension_numbers<[1], [0], [0], [1], [0, 0, 1, 1], [], []>} : vector<128x768xf32>, vector<768x128xf32>, vector<128x128xf32> -> vector<128x128xf32>
    %c0_3 = arith.constant 0 : index
    %c0_4 = arith.constant 0 : index
    %3 = vector.load %arg3[%c0_3, %c0_4] : memref<1x128xf32, #tpu.memory_space<vmem>>, vector<1x128xf32>
    %4 = vector.broadcast %3 : vector<1x128xf32> to vector<128x128xf32>
    %5 = arith.addf %2, %4 : vector<128x128xf32>
    %cst_5 = arith.constant dense<0.000000e+00> : vector<128xf32>
    %6 = vector.multi_reduction <add>, %5, %cst_5 [1] : vector<128x128xf32> to vector<128xf32>
    %7 = vector.shape_cast %6 : vector<128xf32> to vector<128x1xf32>
    %cst_6 = arith.constant 1.280000e+02 : f32
    %8 = vector.broadcast %cst_6 : f32 to vector<128x1xf32>
    %9 = arith.divf %7, %8 : vector<128x1xf32>
    %10 = vector.broadcast %9 : vector<128x1xf32> to vector<128x128xf32>
    %11 = arith.subf %5, %10 : vector<128x128xf32>
    %12 = arith.mulf %11, %11 : vector<128x128xf32>
    %cst_7 = arith.constant dense<0.000000e+00> : vector<128xf32>
    %13 = vector.multi_reduction <add>, %12, %cst_7 [1] : vector<128x128xf32> to vector<128xf32>
    %14 = vector.shape_cast %13 : vector<128xf32> to vector<128x1xf32>
    %cst_8 = arith.constant 1.280000e+02 : f32
    %15 = vector.broadcast %cst_8 : f32 to vector<128x1xf32>
    %16 = arith.divf %14, %15 : vector<128x1xf32>
    %17 = vector.broadcast %9 : vector<128x1xf32> to vector<128x128xf32>
    %18 = arith.subf %5, %17 : vector<128x128xf32>
    %cst_9 = arith.constant 9.99999974E-6 : f32
    %19 = vector.broadcast %cst_9 : f32 to vector<128x1xf32>
    %20 = arith.addf %16, %19 : vector<128x1xf32>
    %21 = math.rsqrt %20 : vector<128x1xf32>
    %22 = vector.broadcast %21 : vector<128x1xf32> to vector<128x128xf32>
    %23 = arith.mulf %18, %22 : vector<128x128xf32>
    %c0_10 = arith.constant 0 : index
    %c0_11 = arith.constant 0 : index
    %24 = vector.load %arg4[%c0_10, %c0_11] : memref<1x128xf32, #tpu.memory_space<vmem>>, vector<1x128xf32>
    %25 = vector.broadcast %24 : vector<1x128xf32> to vector<128x128xf32>
    %26 = arith.mulf %23, %25 : vector<128x128xf32>
    %c0_12 = arith.constant 0 : index
    %c0_13 = arith.constant 0 : index
    %27 = vector.load %arg5[%c0_12, %c0_13] : memref<1x128xf32, #tpu.memory_space<vmem>>, vector<1x128xf32>
    %28 = vector.broadcast %27 : vector<1x128xf32> to vector<128x128xf32>
    %29 = arith.addf %26, %28 : vector<128x128xf32>
    %c0_14 = arith.constant 0 : index
    %c0_15 = arith.constant 0 : index
    %30 = vector.load %arg6[%c0_14, %c0_15] : memref<128x128xf32, #tpu.memory_space<vmem>>, vector<128x128xf32>
    tpu.vector_store %arg6[%c0_14, %c0_15], %29 {strides = array<i32>} : memref<128x128xf32, #tpu.memory_space<vmem>>, vector<128x128xf32>,
    return
  }
  func.func @transform_0(%arg0: i32) -> (i32, i32) {
    %c0_i32 = arith.constant 0 : i32
    %c0_i32_0 = arith.constant 0 : i32
    return %arg0, %c0_i32 : i32, i32
  }
  func.func @transform_1(%arg0: i32) -> (i32, i32) {
    %c0_i32 = arith.constant 0 : i32
    %c0_i32_0 = arith.constant 0 : i32
    %c0_i32_1 = arith.constant 0 : i32
    return %c0_i32, %c0_i32_0 : i32, i32
  }
  func.func @transform_2(%arg0: i32) -> (i32, i32) {
    %c0_i32 = arith.constant 0 : i32
    %c0_i32_0 = arith.constant 0 : i32
    %c0_i32_1 = arith.constant 0 : i32
    return %c0_i32, %c0_i32_0 : i32, i32
  }
  func.func @transform_3(%arg0: i32) -> (i32, i32) {
    %c0_i32 = arith.constant 0 : i32
    %c0_i32_0 = arith.constant 0 : i32
    %c0_i32_1 = arith.constant 0 : i32
    return %c0_i32, %c0_i32_0 : i32, i32
  }
  func.func @transform_4(%arg0: i32) -> (i32, i32) {
    %c0_i32 = arith.constant 0 : i32
    %c0_i32_0 = arith.constant 0 : i32
    %c0_i32_1 = arith.constant 0 : i32
    return %c0_i32, %c0_i32_0 : i32, i32
  }
  func.func @transform_5(%arg0: i32) -> (i32, i32) {
    %c0_i32 = arith.constant 0 : i32
    %c0_i32_0 = arith.constant 0 : i32
    return %arg0, %c0_i32 : i32, i32
  }
}

</mosaic_0001>

<bundles_post_ra>
// kernel: overlap_patch_embeddings.1
= control target key start
LH: loop header
LB: loop body
LE: loop exit
PB: predicated region body
PF: predicated region fallthrough
CT: control target
= control target key end

     0   :  { %s2185_s0 = inlined_call_operand.vmem [shape: f32[128,768], index: 0, kind: input, shape index: {}]   ;;  %s2186_s1 = inlined_call_operand.vmem [shape: f32[768,128], index: 1, kind: input, shape index: {}]   ;;  %s2187_s2 = inlined_call_operand.vmem [shape: f32[1,128], index: 2, kind: input, shape index: {}]   ;;  %s2188_s3 = inlined_call_operand.vmem [shape: f32[1,128], index: 3, kind: input, shape index: {}]   ;;  %s2189_s4 = inlined_call_operand.vmem [shape: f32[1,128], index: 4, kind: input, shape index: {}]   ;;  %s2190_s5 = inlined_call_operand.hbm [shape: f32[128,128], index: 5, kind: output, shape index: {}]  }
   0x1   :  { %v133_v0 = vld [vmem:[%s2186_s1 + $0x80] sm:$0xff]  ;;  %v134_v1 = vld [vmem:[%s2186_s1 + $0x88] sm:$0xff]  ;;  %v135_v5 = vld [vmem:[%s2186_s1 + $0x90] sm:$0xff] }
   0x2   :  { %v117_v2 = vld [vmem:[%s2186_s1] sm:$0xff]  ;;  %v1153_v3 = vpack.c.bf16 %v134_v1, %v133_v0  ;;  %v118_v4 = vld [vmem:[%s2186_s1 + $0x8] sm:$0xff]  ;;  %v136_v6 = vld [vmem:[%s2186_s1 + $0x98] sm:$0xff] }
   0x3   :  { %v1155_v7 = vpack.c.bf16 %v118_v4, %v117_v2  ;;  %v1157_v8 = vpack.c.bf16 %v136_v6, %v135_v5  ;;  %v119_v9 = vld [vmem:[%s2186_s1 + $0x10] sm:$0xff]  ;;  %v120_v10 = vld [vmem:[%s2186_s1 + $0x18] sm:$0xff]  ;;  %v137_v11 = vld [vmem:[%s2186_s1 + $0xa0] sm:$0xff] }
   0x4   :  { %1249 = vmatprep.subr.bf16.mxu1 %v1153_v3  ;;  %1154 = vmatprep.subr.bf16.mxu0 %v1153_v3  ;;  %v138_v12 = vld [vmem:[%s2186_s1 + $0xa8] sm:$0xff]  ;;  %v1159_v13 = vpack.c.bf16 %v120_v10, %v119_v9  ;;  %v121_v15 = vld [vmem:[%s2186_s1 + $0x20] sm:$0xff]  ;;  %v139_v17 = vld [vmem:[%s2186_s1 + $0xb0] sm:$0xff] }
   0x5   :  { %1257 = vmatpush3.bf16.msra.mxu1 %v1155_v7  ;;  %1156 = vmatpush3.bf16.msra.mxu0 %v1155_v7  ;;  %v1161_v14 = vpack.c.bf16 %v138_v12, %v137_v11  ;;  %v122_v16 = vld [vmem:[%s2186_s1 + $0x28] sm:$0xff]  ;;  %v140_v18 = vld [vmem:[%s2186_s1 + $0xb8] sm:$0xff]  ;;  %v123_v21 = vld [vmem:[%s2186_s1 + $0x30] sm:$0xff] }
   0x6   :  { %1250 = vmatprep.subr.bf16.mxu1 %v1157_v8  ;;  %1158 = vmatprep.subr.bf16.mxu0 %v1157_v8  ;;  %v1163_v19 = vpack.c.bf16 %v122_v16, %v121_v15  ;;  %v1165_v20 = vpack.c.bf16 %v140_v18, %v139_v17  ;;  %v124_v22 = vld [vmem:[%s2186_s1 + $0x38] sm:$0xff]  ;;  %v141_v23 = vld [vmem:[%s2186_s1 + $0xc0] sm:$0xff]  ;;  %v142_v24 = vld [vmem:[%s2186_s1 + $0xc8] sm:$0xff] }
   0x7   :  { %v70_v25 = vld [vmem:[%s2185_s0 + $0x188] sm:$0xff]  ;;  %v1167_v26 = vpack.c.bf16 %v124_v22, %v123_v21  ;;  %v1169_v28 = vpack.c.bf16 %v142_v24, %v141_v23  ;;  %v125_v29 = vld [vmem:[%s2186_s1 + $0x40] sm:$0xff]  ;;  %v143_v31 = vld [vmem:[%s2186_s1 + $0xd0] sm:$0xff] }
   0x8   :  { %324 = vmatprep.mubr.f32.mxu1 %v70_v25  ;;  %v22_v27 = vld [vmem:[%s2185_s0 + $0x8] sm:$0xff]  ;;  %v144_v32 = vld [vmem:[%s2186_s1 + $0xd8] sm:$0xff]  ;;  %v127_v35 = vld [vmem:[%s2186_s1 + $0x50] sm:$0xff] }
   0x9   :  { %1258 = vmatpush3.bf16.msra.mxu1 %v1159_v13  ;;  %1160 = vmatpush3.bf16.msra.mxu0 %v1159_v13  ;;  %v126_v30 = vld [vmem:[%s2186_s1 + $0x48] sm:$0xff]  ;;  %v1173_v34 = vpack.c.bf16 %v144_v32, %v143_v31  ;;  %v128_v36 = vld [vmem:[%s2186_s1 + $0x58] sm:$0xff]  ;;  %v145_v37 = vld [vmem:[%s2186_s1 + $0xe0] sm:$0xff] }
   0xa   :  { %1251 = vmatprep.subr.bf16.mxu1 %v1161_v14  ;;  %1162 = vmatprep.subr.bf16.mxu0 %v1161_v14  ;;  %v1171_v33 = vpack.c.bf16 %v126_v30, %v125_v29  ;;  %v146_v38 = vld [vmem:[%s2186_s1 + $0xe8] sm:$0xff]  ;;  %v1175_v39 = vpack.c.bf16 %v128_v36, %v127_v35  ;;  %v129_v41 = vld [vmem:[%s2186_s1 + $0x60] sm:$0xff]  ;;  %v147_v43 = vld [vmem:[%s2186_s1 + $0xf0] sm:$0xff] }
   0xb   :  { %284 = vmatprep.mubr.f32.mxu0 %v22_v27  ;;  %v1177_v40 = vpack.c.bf16 %v146_v38, %v145_v37  ;;  %v130_v42 = vld [vmem:[%s2186_s1 + $0x68] sm:$0xff]  ;;  %v148_v44 = vld [vmem:[%s2186_s1 + $0xf8] sm:$0xff]  ;;  %v131_v47 = vld [vmem:[%s2186_s1 + $0x70] sm:$0xff] }
   0xc   :  { %v1179_v45 = vpack.c.bf16 %v130_v42, %v129_v41  ;;  %v1181_v46 = vpack.c.bf16 %v148_v44, %v147_v43  ;;  %v132_v48 = vld [vmem:[%s2186_s1 + $0x78] sm:$0xff]  ;;  %v165_v49 = vld [vmem:[%s2186_s1 + $0x180] sm:$0xff]  ;;  %v166_v50 = vld [vmem:[%s2186_s1 + $0x188] sm:$0xff] }
   0xd   :  { %1259 = vmatpush3.bf16.msra.mxu1 %v1163_v19  ;;  %1164 = vmatpush3.bf16.msra.mxu0 %v1163_v19  ;;  %v197_v51 = vld [vmem:[%s2186_s1 + $0x280] sm:$0xff]  ;;  %v198_v52 = vld [vmem:[%s2186_s1 + $0x288] sm:$0xff]  ;;  %v1183_v53 = vpack.c.bf16 %v132_v48, %v131_v47  ;;  %v1185_v54 = vpack.c.bf16 %v166_v50, %v165_v49  ;;  %v167_v60 = vld [vmem:[%s2186_s1 + $0x190] sm:$0xff] }
   0xe   :  { %1252 = vmatprep.subr.bf16.mxu1 %v1165_v20  ;;  %1166 = vmatprep.subr.bf16.mxu0 %v1165_v20  ;;  %v149_v55 = vld [vmem:[%s2186_s1 + $0x100] sm:$0xff]  ;;  %v150_v56 = vld [vmem:[%s2186_s1 + $0x108] sm:$0xff]  ;;  %v1217_v57 = vpack.c.bf16 %v198_v52, %v197_v51  ;;  %v168_v61 = vld [vmem:[%s2186_s1 + $0x198] sm:$0xff] }
   0xf   :  { %v181_v58 = vld [vmem:[%s2186_s1 + $0x200] sm:$0xff]  ;;  %v182_v59 = vld [vmem:[%s2186_s1 + $0x208] sm:$0xff]  ;;  %v199_v62 = vld [vmem:[%s2186_s1 + $0x290] sm:$0xff]  ;;  %v1187_v1 = vpack.c.bf16 %v150_v56, %v149_v55  ;;  %v1189_v5 = vpack.c.bf16 %v168_v61, %v167_v60 }
  0x10   :  { %v200_v63 = vld [vmem:[%s2186_s1 + $0x298] sm:$0xff]  ;;  %v69_v0 = vld [vmem:[%s2185_s0 + $0x180] sm:$0xff]  ;;  %v1219_v4 = vpack.c.bf16 %v182_v59, %v181_v58  ;;  %v151_v6 = vld [vmem:[%s2186_s1 + $0x110] sm:$0xff] }
  0x11   :  { %1260 = vmatpush3.bf16.msra.mxu1 %v1167_v26  ;;  %1168 = vmatpush3.bf16.msra.mxu0 %v1167_v26  ;;  %v21_v2 = vld [vmem:[%s2185_s0] sm:$0xff]  ;;  %v76_v3 = vld [vmem:[%s2185_s0 + $0x1b8] sm:$0xff]  ;;  %v183_v8 = vld [vmem:[%s2186_s1 + $0x210] sm:$0xff]  ;;  %v1221_v9 = vpack.c.bf16 %v200_v63, %v199_v62 }
  0x12   :  { %1253 = vmatprep.subr.bf16.mxu1 %v1169_v28  ;;  %1170 = vmatprep.subr.bf16.mxu0 %v1169_v28  ;;  %v152_v7 = vld [vmem:[%s2186_s1 + $0x118] sm:$0xff]  ;;  %v169_v11 = vld [vmem:[%s2186_s1 + $0x1a0] sm:$0xff]  ;;  %v170_v12 = vld [vmem:[%s2186_s1 + $0x1a8] sm:$0xff] }
  0x13   :  { %v184_v10 = vld [vmem:[%s2186_s1 + $0x218] sm:$0xff]  ;;  %v201_v14 = vld [vmem:[%s2186_s1 + $0x2a0] sm:$0xff]  ;;  %v202_v15 = vld [vmem:[%s2186_s1 + $0x2a8] sm:$0xff]  ;;  %v1191_v17 = vpack.c.bf16 %v152_v7, %v151_v6  ;;  %v1193_v21 = vpack.c.bf16 %v170_v12, %v169_v11 }
  0x14   :  { %v28_v13 = vld [vmem:[%s2185_s0 + $0x38] sm:$0xff]  ;;  %v75_v16 = vld [vmem:[%s2185_s0 + $0x1b0] sm:$0xff]  ;;  %v82_v19 = vld [vmem:[%s2185_s0 + $0x1e8] sm:$0xff]  ;;  %v1223_v20 = vpack.c.bf16 %v184_v10, %v183_v8  ;;  %v1225_v25 = vpack.c.bf16 %v202_v15, %v201_v14 }
  0x15   :  { %1261 = vmatpush3.bf16.msra.mxu1 %v1171_v33  ;;  %1172 = vmatpush3.bf16.msra.mxu0 %v1171_v33  ;;  %v27_v18 = vld [vmem:[%s2185_s0 + $0x30] sm:$0xff]  ;;  %v153_v22 = vld [vmem:[%s2186_s1 + $0x120] sm:$0xff]  ;;  %v154_v23 = vld [vmem:[%s2186_s1 + $0x128] sm:$0xff] }
  0x16   :  { %1254 = vmatprep.subr.bf16.mxu1 %v1173_v34  ;;  %1174 = vmatprep.subr.bf16.mxu0 %v1173_v34  ;;  %v185_v24 = vld [vmem:[%s2186_s1 + $0x220] sm:$0xff]  ;;  %v186_v26 = vld [vmem:[%s2186_s1 + $0x228] sm:$0xff]  ;;  %v171_v27 = vld [vmem:[%s2186_s1 + $0x1b0] sm:$0xff]  ;;  %v1195_v33 = vpack.c.bf16 %v154_v23, %v153_v22 }
  0x17   :  { %v172_v28 = vld [vmem:[%s2186_s1 + $0x1b8] sm:$0xff]  ;;  %v34_v29 = vld [vmem:[%s2185_s0 + $0x68] sm:$0xff]  ;;  %v203_v30 = vld [vmem:[%s2186_s1 + $0x2b0] sm:$0xff]  ;;  %v1227_v36 = vpack.c.bf16 %v186_v26, %v185_v24 }
  0x18   :  { %v204_v31 = vld [vmem:[%s2186_s1 + $0x2b8] sm:$0xff]  ;;  %v81_v32 = vld [vmem:[%s2185_s0 + $0x1e0] sm:$0xff]  ;;  %v1197_v37 = vpack.c.bf16 %v172_v28, %v171_v27  ;;  %v155_v38 = vld [vmem:[%s2186_s1 + $0x130] sm:$0xff] }
  0x19   :  { %1262 = vmatpush3.bf16.msra.mxu1 %v1175_v39  ;;  %1176 = vmatpush3.bf16.msra.mxu0 %v1175_v39  ;;  %v33_v34 = vld [vmem:[%s2185_s0 + $0x60] sm:$0xff]  ;;  %v88_v35 = vld [vmem:[%s2185_s0 + $0x218] sm:$0xff]  ;;  %v1229_v41 = vpack.c.bf16 %v204_v31, %v203_v30  ;;  %v174_v44 = vld [vmem:[%s2186_s1 + $0x1c8] sm:$0xff] }
  0x1a   :  { %1255 = vmatprep.subr.bf16.mxu1 %v1177_v40  ;;  %1178 = vmatprep.subr.bf16.mxu0 %v1177_v40  ;;  %v156_v39 = vld [vmem:[%s2186_s1 + $0x138] sm:$0xff]  ;;  %v187_v40 = vld [vmem:[%s2186_s1 + $0x230] sm:$0xff]  ;;  %v173_v43 = vld [vmem:[%s2186_s1 + $0x1c0] sm:$0xff] }
  0x1b   :  { %v188_v42 = vld [vmem:[%s2186_s1 + $0x238] sm:$0xff]  ;;  %v206_v47 = vld [vmem:[%s2186_s1 + $0x2c8] sm:$0xff]  ;;  %v87_v48 = vld [vmem:[%s2185_s0 + $0x210] sm:$0xff]  ;;  %v1199_v49 = vpack.c.bf16 %v156_v39, %v155_v38 }
  0x1c   :  { %v39_v50 = vld [vmem:[%s2185_s0 + $0x90] sm:$0xff]  ;;  %v94_v51 = vld [vmem:[%s2185_s0 + $0x248] sm:$0xff]  ;;  %v1231_v52 = vpack.c.bf16 %v188_v42, %v187_v40  ;;  %v189_v56 = vld [vmem:[%s2186_s1 + $0x240] sm:$0xff] }
  0x1d   :  { %1263 = vmatpush3.bf16.msra.mxu1 %v1179_v45  ;;  %1180 = vmatpush3.bf16.msra.mxu0 %v1179_v45  ;;  %v40_v45 = vld [vmem:[%s2185_s0 + $0x98] sm:$0xff]  ;;  %v158_v55 = vld [vmem:[%s2186_s1 + $0x148] sm:$0xff]  ;;  %v175_v59 = vld [vmem:[%s2186_s1 + $0x1d0] sm:$0xff] }
  0x1e   :  { %1256 = vmatprep.subr.bf16.mxu1 %v1181_v46  ;;  %1182 = vmatprep.subr.bf16.mxu0 %v1181_v46  ;;  %v205_v46 = vld [vmem:[%s2186_s1 + $0x2c0] sm:$0xff]  ;;  %v190_v58 = vld [vmem:[%s2186_s1 + $0x248] sm:$0xff]  ;;  %v176_v60 = vld [vmem:[%s2186_s1 + $0x1d8] sm:$0xff] }
  0x1f   :  { %v46_v61 = vld [vmem:[%s2185_s0 + $0xc8] sm:$0xff]  ;;  %v207_v62 = vld [vmem:[%s2186_s1 + $0x2d0] sm:$0xff]  ;;  %v208_v63 = vld [vmem:[%s2186_s1 + $0x2d8] sm:$0xff] }
  0x20   :  { %v159_v6 = vld [vmem:[%s2186_s1 + $0x150] sm:$0xff]  ;;  %v160_v7 = vld [vmem:[%s2186_s1 + $0x158] sm:$0xff]  ;;  %v177_v11 = vld [vmem:[%s2186_s1 + $0x1e0] sm:$0xff] }
  0x21   :  { %1264 = vmatpush3.bf16.msra.mxu1 %v1183_v53  ;;  %1184 = vmatpush3.bf16.msra.mxu0 %v1183_v53  ;;  %v1201_v53 = vpack.c.bf16 %v174_v44, %v173_v43  ;;  %v191_v8 = vld [vmem:[%s2186_s1 + $0x250] sm:$0xff]  ;;  %v192_v10 = vld [vmem:[%s2186_s1 + $0x258] sm:$0xff]  ;;  %v178_v12 = vld [vmem:[%s2186_s1 + $0x1e8] sm:$0xff] }
  0x22   :  { %1186 = vmatprep.subr.bf16.mxu1 %v1185_v54  ;;  %1218 = vmatprep.subr.bf16.mxu0 %v1217_v57  ;;  %v157_v54 = vld [vmem:[%s2186_s1 + $0x140] sm:$0xff]  ;;  %v1233_v57 = vpack.c.bf16 %v206_v47, %v205_v46  ;;  %v210_v15 = vld [vmem:[%s2186_s1 + $0x2e8] sm:$0xff]  ;;  %v179_v27 = vld [vmem:[%s2186_s1 + $0x1f0] sm:$0xff] }
  0x23   :  { %v209_v14 = vld [vmem:[%s2186_s1 + $0x2e0] sm:$0xff]  ;;  %v162_v23 = vld [vmem:[%s2186_s1 + $0x168] sm:$0xff]  ;;  %v180_v28 = vld [vmem:[%s2186_s1 + $0x1f8] sm:$0xff] }
  0x24   :  { %325 = vmatmul.mubr.f32.vlgmr.msra.gmra.mrb[0].mxu1 %v69_v0  ;;  %285 = vmatmul.mubr.f32.vlgmr.msra.gmra.mrb[0].mxu0 %v21_v2  ;;  %v93_v0 = vld [vmem:[%s2185_s0 + $0x240] sm:$0xff]  ;;  %v194_v26 = vld [vmem:[%s2186_s1 + $0x268] sm:$0xff]  ;;  %v211_v30 = vld [vmem:[%s2186_s1 + $0x2f0] sm:$0xff] }
  0x25   :  { %1188 = vmatpush3.bf16.msra.mxu1 %v1187_v1  ;;  %329 = vmatprep.mubr.f32.mxu1 %v76_v3  ;;  %v1203_v1 = vpack.c.bf16 %v158_v55, %v157_v54  ;;  %v45_v2 = vld [vmem:[%s2185_s0 + $0xc0] sm:$0xff]  ;;  %v100_v3 = vld [vmem:[%s2185_s0 + $0x278] sm:$0xff]  ;;  %v163_v38 = vld [vmem:[%s2186_s1 + $0x170] sm:$0xff] }
  0x26   :  { %1220 = vmatpush3.bf16.msra.mxu0 %v1219_v4  ;;  %1190 = vmatprep.subr.bf16.mxu1 %v1189_v5  ;;  %v1235_v4 = vpack.c.bf16 %v190_v58, %v189_v56  ;;  %v1205_v5 = vpack.c.bf16 %v176_v60, %v175_v59  ;;  %v161_v22 = vld [vmem:[%s2186_s1 + $0x160] sm:$0xff]  ;;  %v212_v31 = vld [vmem:[%s2186_s1 + $0x2f8] sm:$0xff]  ;;  %v111_v44 = vld [vmem:[%s2185_s0 + $0x2d0] sm:$0xff] }
  0x27   :  { %289 = vmatprep.mubr.f32.mxu0 %v28_v13  ;;  %1222 = vmatprep.subr.bf16.mxu0 %v1221_v9  ;;  %v1237_v9 = vpack.c.bf16 %v208_v63, %v207_v62  ;;  %v52_v13 = vld [vmem:[%s2185_s0 + $0xf8] sm:$0xff]  ;;  %v193_v24 = vld [vmem:[%s2186_s1 + $0x260] sm:$0xff]  ;;  %v1245_v40 = vpack.c.bf16 %v212_v31, %v211_v30  ;;  %v63_v46 = vld [vmem:[%s2185_s0 + $0x150] sm:$0xff] }
  0x28   :  { %330 = vmatmul.mubr.f32.gmra.mrb[2].mxu1 %v75_v16  ;;  %290 = vmatmul.mubr.f32.gmra.mrb[2].mxu0 %v27_v18  ;;  %v99_v16 = vld [vmem:[%s2185_s0 + $0x270] sm:$0xff]  ;;  %v164_v39 = vld [vmem:[%s2186_s1 + $0x178] sm:$0xff] }
  0x29   :  { %1192 = vmatpush3.bf16.msra.mxu1 %v1191_v17  ;;  %334 = vmatprep.mubr.f32.mxu1 %v82_v19  ;;  %v1207_v17 = vpack.c.bf16 %v160_v7, %v159_v6  ;;  %v51_v18 = vld [vmem:[%s2185_s0 + $0xf0] sm:$0xff]  ;;  %v106_v19 = vld [vmem:[%s2185_s0 + $0x2a8] sm:$0xff]  ;;  %v196_v42 = vld [vmem:[%s2186_s1 + $0x278] sm:$0xff] }
  0x2a   :  { %1224 = vmatpush3.bf16.msra.mxu0 %v1223_v20  ;;  %1194 = vmatprep.subr.bf16.mxu1 %v1193_v21  ;;  %v1239_v20 = vpack.c.bf16 %v192_v10, %v191_v8  ;;  %v1209_v21 = vpack.c.bf16 %v178_v12, %v177_v11  ;;  %v64_v43 = vld [vmem:[%s2185_s0 + $0x158] sm:$0xff] }
  0x2b   :  { %294 = vmatprep.mubr.f32.mxu0 %v34_v29  ;;  %1226 = vmatprep.subr.bf16.mxu0 %v1225_v25  ;;  %v1241_v25 = vpack.c.bf16 %v210_v15, %v209_v14  ;;  %v58_v29 = vld [vmem:[%s2185_s0 + $0x128] sm:$0xff]  ;;  %v24_v47 = vld [vmem:[%s2185_s0 + $0x18] sm:$0xff] }
  0x2c   :  { %335 = vmatmul.mubr.f32.gmra.mrb[4].mxu1 %v81_v32  ;;  %295 = vmatmul.mubr.f32.gmra.mrb[4].mxu0 %v33_v34  ;;  %v105_v32 = vld [vmem:[%s2185_s0 + $0x2a0] sm:$0xff] }
  0x2d   :  { %1196 = vmatpush3.bf16.msra.mxu1 %v1195_v33  ;;  %339 = vmatprep.mubr.f32.mxu1 %v88_v35  ;;  %v1211_v33 = vpack.c.bf16 %v162_v23, %v161_v22  ;;  %v57_v34 = vld [vmem:[%s2185_s0 + $0x120] sm:$0xff]  ;;  %v112_v35 = vld [vmem:[%s2185_s0 + $0x2d8] sm:$0xff] }
  0x2e   :  { %1228 = vmatpush3.bf16.msra.mxu0 %v1227_v36  ;;  %1198 = vmatprep.subr.bf16.mxu1 %v1197_v37  ;;  %v1243_v36 = vpack.c.bf16 %v194_v26, %v193_v24  ;;  %v1213_v37 = vpack.c.bf16 %v180_v28, %v179_v27 }
  0x2f   :  { %299 = vmatprep.mubr.f32.mxu0 %v40_v45  ;;  %1230 = vmatprep.subr.bf16.mxu0 %v1229_v41  ;;  %v195_v41 = vld [vmem:[%s2186_s1 + $0x270] sm:$0xff]  ;;  %v1215_v45 = vpack.c.bf16 %v164_v39, %v163_v38 }
  0x30   :  { %340 = vmatmul.mubr.f32.gmra.mrb[6].mxu1 %v87_v48  ;;  %300 = vmatmul.mubr.f32.gmra.mrb[6].mxu0 %v39_v50  ;;  %v1247_v48 = vpack.c.bf16 %v196_v42, %v195_v41  ;;  %v23_v50 = vld [vmem:[%s2185_s0 + $0x10] sm:$0xff] }
  0x31   :  { %1200 = vmatpush3.bf16.msra.mxu1 %v1199_v49  ;;  %344 = vmatprep.mubr.f32.mxu1 %v94_v51  ;;  %v26_v49 = vld [vmem:[%s2185_s0 + $0x28] sm:$0xff] }
  0x32   :  { %1232 = vmatpush3.bf16.msra.mxu0 %v1231_v52  ;;  %1202 = vmatprep.subr.bf16.mxu1 %v1201_v53 }
  0x33   :  { %304 = vmatprep.mubr.f32.mxu0 %v46_v61  ;;  %1234 = vmatprep.subr.bf16.mxu0 %v1233_v57 }
  0x34   :  { %345 = vmatmul.mubr.f32.gmra.mrb[8].mxu1 %v93_v0  ;;  %305 = vmatmul.mubr.f32.gmra.mrb[8].mxu0 %v45_v2 }
  0x35   :  { %1204 = vmatpush3.bf16.msra.mxu1 %v1203_v1  ;;  %349 = vmatprep.mubr.f32.mxu1 %v100_v3 }
  0x36   :  { %1236 = vmatpush3.bf16.msra.mxu0 %v1235_v4  ;;  %1206 = vmatprep.subr.bf16.mxu1 %v1205_v5 }
  0x37   :  { %309 = vmatprep.mubr.f32.mxu0 %v52_v13  ;;  %1238 = vmatprep.subr.bf16.mxu0 %v1237_v9 }
  0x38   :  { %350 = vmatmul.mubr.f32.gmra.mrb[10].mxu1 %v99_v16  ;;  %310 = vmatmul.mubr.f32.gmra.mrb[10].mxu0 %v51_v18 }
  0x39   :  { %1208 = vmatpush3.bf16.msra.mxu1 %v1207_v17  ;;  %354 = vmatprep.mubr.f32.mxu1 %v106_v19 }
  0x3a   :  { %1240 = vmatpush3.bf16.msra.mxu0 %v1239_v20  ;;  %1210 = vmatprep.subr.bf16.mxu1 %v1209_v21 }
  0x3b   :  { %314 = vmatprep.mubr.f32.mxu0 %v58_v29  ;;  %1242 = vmatprep.subr.bf16.mxu0 %v1241_v25 }
  0x3c   :  { %355 = vmatmul.mubr.f32.gmra.mrb[12].mxu1 %v105_v32  ;;  %315 = vmatmul.mubr.f32.gmra.mrb[12].mxu0 %v57_v34 }
  0x3d   :  { %1212 = vmatpush3.bf16.msra.mxu1 %v1211_v33  ;;  %359 = vmatprep.mubr.f32.mxu1 %v112_v35 }
  0x3e   :  { %1244 = vmatpush3.bf16.msra.mxu0 %v1243_v36  ;;  %1214 = vmatprep.subr.bf16.mxu1 %v1213_v37 }
  0x3f   :  { %319 = vmatprep.mubr.f32.mxu0 %v64_v43  ;;  %1246 = vmatprep.subr.bf16.mxu0 %v1245_v40 }
  0x40   :  { %360 = vmatmul.mubr.f32.gmra.mrb[14].mxu1 %v111_v44  ;;  %320 = vmatmul.mubr.f32.gmra.mrb[14].mxu0 %v63_v46 }
  0x41   :  { %1216 = vmatpush3.bf16.msra.mxu1 %v1215_v45  ;;  %429 = vmatprep.mubr.f32.mxu1 %v24_v47 }
  0x42   :  { %10 = vsyncpa [#allocation3], 0  ;;  %1248 = vmatpush3.bf16.msra.mxu0 %v1247_v48  ;;  %574 = vmatprep.mubr.f32.mxu0 %v26_v49  ;;  %v25_v51 = vld [vmem:[%s2185_s0 + $0x20] sm:$0xff]  ;;  %v30_v52 = vld [vmem:[%s2185_s0 + $0x48] sm:$0xff] }
  0x43   :  { %v32_v53 = vld [vmem:[%s2185_s0 + $0x58] sm:$0xff]  ;;  %v29_v54 = vld [vmem:[%s2185_s0 + $0x40] sm:$0xff]  ;;  %v31_v55 = vld [vmem:[%s2185_s0 + $0x50] sm:$0xff] }
  0x44   :  { %430 = vmatmul.mubr.f32.vlgmr.msra.gmra.mrb[16].mxu1 %v23_v50  ;;  %v36_v56 = vld [vmem:[%s2185_s0 + $0x78] sm:$0xff]  ;;  %v38_v57 = vld [vmem:[%s2185_s0 + $0x88] sm:$0xff]  ;;  %v35_v58 = vld [vmem:[%s2185_s0 + $0x70] sm:$0xff] }
  0x45   :  { %575 = vmatmul.mubr.f32.vlgmr.msra.gmra.mrb[16].mxu0 %v25_v51  ;;  %434 = vmatprep.mubr.f32.mxu1 %v30_v52  ;;  %v37_v59 = vld [vmem:[%s2185_s0 + $0x80] sm:$0xff]  ;;  %v42_v60 = vld [vmem:[%s2185_s0 + $0xa8] sm:$0xff]  ;;  %v44_v61 = vld [vmem:[%s2185_s0 + $0xb8] sm:$0xff] }
  0x46   :  { %579 = vmatprep.mubr.f32.mxu0 %v32_v53  ;;  %v41_v62 = vld [vmem:[%s2185_s0 + $0xa0] sm:$0xff]  ;;  %v43_v63 = vld [vmem:[%s2185_s0 + $0xb0] sm:$0xff]  ;;  %v48_v0 = vld [vmem:[%s2185_s0 + $0xd8] sm:$0xff] }
  0x47   :  { %v50_v1 = vld [vmem:[%s2185_s0 + $0xe8] sm:$0xff]  ;;  %v47_v2 = vld [vmem:[%s2185_s0 + $0xd0] sm:$0xff]  ;;  %v49_v3 = vld [vmem:[%s2185_s0 + $0xe0] sm:$0xff] }
  0x48   :  { %435 = vmatmul.mubr.f32.gmra.mrb[18].mxu1 %v29_v54  ;;  %v54_v4 = vld [vmem:[%s2185_s0 + $0x108] sm:$0xff]  ;;  %v56_v5 = vld [vmem:[%s2185_s0 + $0x118] sm:$0xff]  ;;  %v53_v6 = vld [vmem:[%s2185_s0 + $0x100] sm:$0xff] }
  0x49   :  { %580 = vmatmul.mubr.f32.gmra.mrb[18].mxu0 %v31_v55  ;;  %439 = vmatprep.mubr.f32.mxu1 %v36_v56  ;;  %v55_v7 = vld [vmem:[%s2185_s0 + $0x110] sm:$0xff]  ;;  %v60_v8 = vld [vmem:[%s2185_s0 + $0x138] sm:$0xff]  ;;  %v62_v9 = vld [vmem:[%s2185_s0 + $0x148] sm:$0xff] }
  0x4a   :  { %584 = vmatprep.mubr.f32.mxu0 %v38_v57  ;;  %v59_v10 = vld [vmem:[%s2185_s0 + $0x130] sm:$0xff]  ;;  %v61_v11 = vld [vmem:[%s2185_s0 + $0x140] sm:$0xff]  ;;  %v66_v12 = vld [vmem:[%s2185_s0 + $0x168] sm:$0xff] }
  0x4b   :  { %v68_v13 = vld [vmem:[%s2185_s0 + $0x178] sm:$0xff]  ;;  %v65_v14 = vld [vmem:[%s2185_s0 + $0x160] sm:$0xff]  ;;  %v67_v15 = vld [vmem:[%s2185_s0 + $0x170] sm:$0xff] }
  0x4c   :  { %440 = vmatmul.mubr.f32.gmra.mrb[20].mxu1 %v35_v58  ;;  %v72_v16 = vld [vmem:[%s2185_s0 + $0x198] sm:$0xff]  ;;  %v74_v17 = vld [vmem:[%s2185_s0 + $0x1a8] sm:$0xff]  ;;  %v71_v18 = vld [vmem:[%s2185_s0 + $0x190] sm:$0xff] }
  0x4d   :  { %585 = vmatmul.mubr.f32.gmra.mrb[20].mxu0 %v37_v59  ;;  %444 = vmatprep.mubr.f32.mxu1 %v42_v60  ;;  %v73_v19 = vld [vmem:[%s2185_s0 + $0x1a0] sm:$0xff]  ;;  %v78_v20 = vld [vmem:[%s2185_s0 + $0x1c8] sm:$0xff]  ;;  %v80_v21 = vld [vmem:[%s2185_s0 + $0x1d8] sm:$0xff] }
  0x4e   :  { %589 = vmatprep.mubr.f32.mxu0 %v44_v61  ;;  %v77_v22 = vld [vmem:[%s2185_s0 + $0x1c0] sm:$0xff]  ;;  %v79_v23 = vld [vmem:[%s2185_s0 + $0x1d0] sm:$0xff]  ;;  %v84_v24 = vld [vmem:[%s2185_s0 + $0x1f8] sm:$0xff] }
  0x4f   :  { %v86_v25 = vld [vmem:[%s2185_s0 + $0x208] sm:$0xff]  ;;  %v83_v26 = vld [vmem:[%s2185_s0 + $0x1f0] sm:$0xff]  ;;  %v85_v27 = vld [vmem:[%s2185_s0 + $0x200] sm:$0xff] }
  0x50   :  { %445 = vmatmul.mubr.f32.gmra.mrb[22].mxu1 %v41_v62  ;;  %v90_v28 = vld [vmem:[%s2185_s0 + $0x228] sm:$0xff]  ;;  %v92_v29 = vld [vmem:[%s2185_s0 + $0x238] sm:$0xff]  ;;  %v89_v30 = vld [vmem:[%s2185_s0 + $0x220] sm:$0xff] }
  0x51   :  { %590 = vmatmul.mubr.f32.gmra.mrb[22].mxu0 %v43_v63  ;;  %449 = vmatprep.mubr.f32.mxu1 %v48_v0  ;;  %v91_v31 = vld [vmem:[%s2185_s0 + $0x230] sm:$0xff]  ;;  %v96_v32 = vld [vmem:[%s2185_s0 + $0x258] sm:$0xff]  ;;  %v98_v33 = vld [vmem:[%s2185_s0 + $0x268] sm:$0xff] }
  0x52   :  { %594 = vmatprep.mubr.f32.mxu0 %v50_v1  ;;  %v95_v34 = vld [vmem:[%s2185_s0 + $0x250] sm:$0xff]  ;;  %v97_v35 = vld [vmem:[%s2185_s0 + $0x260] sm:$0xff]  ;;  %v102_v36 = vld [vmem:[%s2185_s0 + $0x288] sm:$0xff] }
  0x53   :  { %v104_v37 = vld [vmem:[%s2185_s0 + $0x298] sm:$0xff]  ;;  %v101_v38 = vld [vmem:[%s2185_s0 + $0x280] sm:$0xff]  ;;  %v103_v39 = vld [vmem:[%s2185_s0 + $0x290] sm:$0xff] }
  0x54   :  { %450 = vmatmul.mubr.f32.gmra.mrb[24].mxu1 %v47_v2  ;;  %v108_v40 = vld [vmem:[%s2185_s0 + $0x2b8] sm:$0xff]  ;;  %v110_v41 = vld [vmem:[%s2185_s0 + $0x2c8] sm:$0xff]  ;;  %v107_v42 = vld [vmem:[%s2185_s0 + $0x2b0] sm:$0xff] }
  0x55   :  { %595 = vmatmul.mubr.f32.gmra.mrb[24].mxu0 %v49_v3  ;;  %454 = vmatprep.mubr.f32.mxu1 %v54_v4  ;;  %v109_v43 = vld [vmem:[%s2185_s0 + $0x2c0] sm:$0xff]  ;;  %v114_v44 = vld [vmem:[%s2185_s0 + $0x2e8] sm:$0xff]  ;;  %v116_v45 = vld [vmem:[%s2185_s0 + $0x2f8] sm:$0xff] }
  0x56   :  { %599 = vmatprep.mubr.f32.mxu0 %v56_v5  ;;  %v113_v46 = vld [vmem:[%s2185_s0 + $0x2e0] sm:$0xff]  ;;  %v115_v47 = vld [vmem:[%s2185_s0 + $0x2f0] sm:$0xff] }
  0x58   :  { %455 = vmatmul.mubr.f32.gmra.mrb[26].mxu1 %v53_v6 }
  0x59   :  { %600 = vmatmul.mubr.f32.gmra.mrb[26].mxu0 %v55_v7  ;;  %459 = vmatprep.mubr.f32.mxu1 %v60_v8 }
  0x5a   :  { %604 = vmatprep.mubr.f32.mxu0 %v62_v9 }
  0x5c   :  { %460 = vmatmul.mubr.f32.gmra.mrb[28].mxu1 %v59_v10 }
  0x5d   :  { %605 = vmatmul.mubr.f32.gmra.mrb[28].mxu0 %v61_v11  ;;  %464 = vmatprep.mubr.f32.mxu1 %v66_v12 }
  0x5e   :  { %609 = vmatprep.mubr.f32.mxu0 %v68_v13 }
  0x60   :  { %465 = vmatmul.mubr.f32.gmra.mrb[30].mxu1 %v65_v14 }
  0x61   :  { %610 = vmatmul.mubr.f32.gmra.mrb[30].mxu0 %v67_v15  ;;  %469 = vmatprep.mubr.f32.mxu1 %v72_v16 }
  0x62   :  { %614 = vmatprep.mubr.f32.mxu0 %v74_v17 }
  0x64   :  { %470 = vmatmul.mubr.f32.gmra.mrb[32].mxu1 %v71_v18 }
  0x65   :  { %615 = vmatmul.mubr.f32.gmra.mrb[32].mxu0 %v73_v19  ;;  %474 = vmatprep.mubr.f32.mxu1 %v78_v20 }
  0x66   :  { %619 = vmatprep.mubr.f32.mxu0 %v80_v21 }
  0x68   :  { %475 = vmatmul.mubr.f32.gmra.mrb[34].mxu1 %v77_v22 }
  0x69   :  { %620 = vmatmul.mubr.f32.gmra.mrb[34].mxu0 %v79_v23  ;;  %479 = vmatprep.mubr.f32.mxu1 %v84_v24 }
  0x6a   :  { %624 = vmatprep.mubr.f32.mxu0 %v86_v25 }
  0x6c   :  { %480 = vmatmul.mubr.f32.gmra.mrb[36].mxu1 %v83_v26 }
  0x6d   :  { %625 = vmatmul.mubr.f32.gmra.mrb[36].mxu0 %v85_v27  ;;  %484 = vmatprep.mubr.f32.mxu1 %v90_v28 }
  0x6e   :  { %629 = vmatprep.mubr.f32.mxu0 %v92_v29 }
  0x70   :  { %485 = vmatmul.mubr.f32.gmra.mrb[38].mxu1 %v89_v30 }
  0x71   :  { %630 = vmatmul.mubr.f32.gmra.mrb[38].mxu0 %v91_v31  ;;  %489 = vmatprep.mubr.f32.mxu1 %v96_v32  ;;  %v1958_v32 = vld [vmem:[%s2187_s2] ss:$0 sm:$0xff] }
  0x72   :  { %634 = vmatprep.mubr.f32.mxu0 %v98_v33 }
  0x74   :  { %490 = vmatmul.mubr.f32.gmra.mrb[40].mxu1 %v95_v34 }
  0x75   :  { %635 = vmatmul.mubr.f32.gmra.mrb[40].mxu0 %v97_v35  ;;  %494 = vmatprep.mubr.f32.mxu1 %v102_v36 }
  0x76   :  { %639 = vmatprep.mubr.f32.mxu0 %v104_v37 }
  0x78   :  { %495 = vmatmul.mubr.f32.gmra.mrb[42].mxu1 %v101_v38 }
  0x79   :  { %640 = vmatmul.mubr.f32.gmra.mrb[42].mxu0 %v103_v39  ;;  %499 = vmatprep.mubr.f32.mxu1 %v108_v40 }
  0x7a   :  { %644 = vmatprep.mubr.f32.mxu0 %v110_v41 }
  0x7c   :  { %500 = vmatmul.mubr.f32.gmra.mrb[44].mxu1 %v107_v42 }
  0x7d   :  { %645 = vmatmul.mubr.f32.gmra.mrb[44].mxu0 %v109_v43  ;;  %504 = vmatprep.mubr.f32.mxu1 %v114_v44 }
  0x7e   :  { %649 = vmatprep.mubr.f32.mxu0 %v116_v45 }
  0x80   :  { %505 = vmatmul.mubr.f32.gmra.mrb[46].mxu1 %v113_v46 }
  0x81   :  { %650 = vmatmul.mubr.f32.gmra.mrb[46].mxu0 %v115_v47 }
  0xf7   :  { %v969_v48 = vpop.f32.mrb[0].mxu1  ;;  %v945_v49 = vpop.f32.mrb[0].mxu0 }
  0xf8   :  { %v970_v50 = vpop.f32.mrb[1].mxu1  ;;  %v946_v51 = vpop.f32.mrb[1].mxu0 }
  0xf9   :  { %v1933_v52 = vadd.f32 %v970_v50, %v969_v48  ;;  %v947_v53 = vadd.f32 %v946_v51, %v945_v49 }
  0xfb   :  { %v972_v54 = vpop.f32.mrb[2].mxu1  ;;  %v948_v55 = vpop.f32.mrb[2].mxu0  ;;  %v287_v36 = vadd.f32 %v947_v53, %v1958_v32 }
  0xfc   :  { %v973_v56 = vpop.f32.mrb[3].mxu1  ;;  %v949_v57 = vpop.f32.mrb[3].mxu0 }
  0xfd   :  { %v1935_v58 = vadd.f32 %v973_v56, %v972_v54  ;;  %v950_v59 = vadd.f32 %v949_v57, %v948_v55 }
  0xff   :  { %v975_v60 = vpop.f32.mrb[4].mxu1  ;;  %v951_v61 = vpop.f32.mrb[4].mxu0  ;;  %v292_v44 = vadd.f32 %v950_v59, %v1958_v32 }
 0x100   :  { %v976_v62 = vpop.f32.mrb[5].mxu1  ;;  %v952_v63 = vpop.f32.mrb[5].mxu0 }
 0x101   :  { %v1937_v0 = vadd.f32 %v976_v62, %v975_v60  ;;  %v953_v1 = vadd.f32 %v952_v63, %v951_v61 }
 0x103   :  { %v978_v2 = vpop.f32.mrb[6].mxu1  ;;  %v954_v3 = vpop.f32.mrb[6].mxu0  ;;  %v297_v54 = vadd.f32 %v953_v1, %v1958_v32 }
 0x104   :  { %v979_v4 = vpop.f32.mrb[7].mxu1  ;;  %v955_v5 = vpop.f32.mrb[7].mxu0 }
 0x105   :  { %v1939_v6 = vadd.f32 %v979_v4, %v978_v2  ;;  %v956_v7 = vadd.f32 %v955_v5, %v954_v3 }
 0x107   :  { %v981_v8 = vpop.f32.mrb[8].mxu1  ;;  %v957_v9 = vpop.f32.mrb[8].mxu0  ;;  %v302_v2 = vadd.f32 %v956_v7, %v1958_v32 }
 0x108   :  { %v982_v10 = vpop.f32.mrb[9].mxu1  ;;  %v958_v11 = vpop.f32.mrb[9].mxu0 }
 0x109   :  { %v1941_v12 = vadd.f32 %v982_v10, %v981_v8  ;;  %v959_v13 = vadd.f32 %v958_v11, %v957_v9 }
 0x10b   :  { %v984_v14 = vpop.f32.mrb[10].mxu1  ;;  %v960_v15 = vpop.f32.mrb[10].mxu0 }
 0x10c   :  { %v985_v16 = vpop.f32.mrb[11].mxu1  ;;  %v961_v17 = vpop.f32.mrb[11].mxu0 }
 0x10d   :  { %v1943_v18 = vadd.f32 %v985_v16, %v984_v14  ;;  %v1945_v19 = vadd.f32 %v961_v17, %v960_v15  ;;  %v307_v14 = vadd.f32 %v959_v13, %v1958_v32 }
 0x10f   :  { %v987_v20 = vpop.f32.mrb[12].mxu1  ;;  %v963_v21 = vpop.f32.mrb[12].mxu0 }
 0x110   :  { %v988_v22 = vpop.f32.mrb[13].mxu1  ;;  %v964_v23 = vpop.f32.mrb[13].mxu0 }
 0x111   :  { %v1947_v24 = vadd.f32 %v988_v22, %v987_v20  ;;  %v1949_v25 = vadd.f32 %v964_v23, %v963_v21 }
 0x113   :  { %v990_v26 = vpop.f32.mrb[14].mxu1  ;;  %v966_v27 = vpop.f32.mrb[14].mxu0 }
 0x114   :  { %v991_v28 = vpop.f32.mrb[15].mxu1  ;;  %v967_v29 = vpop.f32.mrb[15].mxu0 }
 0x115   :  { %v1951_v30 = vadd.f32 %v991_v28, %v990_v26  ;;  %v1953_v31 = vadd.f32 %v967_v29, %v966_v27  ;;  %v312_v26 = vadd.f32 %v1945_v19, %v1958_v32 }
 0x117   :  { %v1025_v33 = vpop.f32.mrb[16].mxu1 }
 0x118   :  { %v1026_v34 = vpop.f32.mrb[17].mxu1  ;;  %v1105_v35 = vpop.f32.mrb[16].mxu0 }
 0x119   :  { %v1027_v37 = vadd.f32 %v1026_v34, %v1025_v33  ;;  %v1106_v38 = vpop.f32.mrb[17].mxu0 }
 0x11a   :  { %v1107_v39 = vadd.f32 %v1106_v38, %v1105_v35 }
 0x11b   :  { %v432_v40 = vadd.f32 %v1027_v37, %v287_v36  ;;  %v1028_v41 = vpop.f32.mrb[18].mxu1  ;;  %v317_v37 = vadd.f32 %v1949_v25, %v1958_v32 }
 0x11c   :  { %v1029_v42 = vpop.f32.mrb[19].mxu1  ;;  %v1108_v43 = vpop.f32.mrb[18].mxu0 }
 0x11d   :  { %v1030_v45 = vadd.f32 %v1029_v42, %v1028_v41  ;;  %v1109_v46 = vpop.f32.mrb[19].mxu0  ;;  %v1962_v47 = vadd.f32 %v1107_v39, %v432_v40 }
 0x11e   :  { %v1110_v48 = vadd.f32 %v1109_v46, %v1108_v43 }
 0x11f   :  { %v437_v49 = vadd.f32 %v1030_v45, %v292_v44  ;;  %v1031_v50 = vpop.f32.mrb[20].mxu1  ;;  %655 = vadd.xlane.f32.xlu0 %v1962_v47  ;;  %v322_v45 = vadd.f32 %v1953_v31, %v1958_v32 }
 0x120   :  { %v1032_v51 = vpop.f32.mrb[21].mxu1  ;;  %v1111_v53 = vpop.f32.mrb[20].mxu0 }
 0x121   :  { %v1033_v55 = vadd.f32 %v1032_v51, %v1031_v50  ;;  %v1112_v56 = vpop.f32.mrb[21].mxu0  ;;  %v1966_v57 = vadd.f32 %v1110_v48, %v437_v49 }
 0x122   :  { %v1113_v60 = vadd.f32 %v1112_v56, %v1111_v53 }
 0x123   :  { %v442_v61 = vadd.f32 %v1033_v55, %v297_v54  ;;  %v1034_v59 = vpop.f32.mrb[22].mxu1  ;;  %657 = vadd.xlane.f32.xlu0 %v1966_v57  ;;  %v327_v55 = vadd.f32 %v1933_v52, %v1958_v32 }
 0x124   :  { %v1035_v62 = vpop.f32.mrb[23].mxu1  ;;  %v1114_v63 = vpop.f32.mrb[22].mxu0 }
 0x125   :  { %v1036_v3 = vadd.f32 %v1035_v62, %v1034_v59  ;;  %v1115_v4 = vpop.f32.mrb[23].mxu0  ;;  %v1970_v5 = vadd.f32 %v1113_v60, %v442_v61 }
 0x126   :  { %v1116_v8 = vadd.f32 %v1115_v4, %v1114_v63 }
 0x127   :  { %v447_v9 = vadd.f32 %v1036_v3, %v302_v2  ;;  %v1037_v1 = vpop.f32.mrb[24].mxu1  ;;  %659 = vadd.xlane.f32.xlu1 %v1970_v5  ;;  %v332_v3 = vadd.f32 %v1935_v58, %v1958_v32 }
 0x128   :  { %v1038_v10 = vpop.f32.mrb[25].mxu1  ;;  %v1117_v11 = vpop.f32.mrb[24].mxu0 }
 0x129   :  { %v1039_v15 = vadd.f32 %v1038_v10, %v1037_v1  ;;  %v1118_v16 = vpop.f32.mrb[25].mxu0  ;;  %v1974_v17 = vadd.f32 %v1116_v8, %v447_v9 }
 0x12a   :  { %v1119_v20 = vadd.f32 %v1118_v16, %v1117_v11 }
 0x12b   :  { %v452_v21 = vadd.f32 %v1039_v15, %v307_v14  ;;  %v1040_v7 = vpop.f32.mrb[26].mxu1  ;;  %661 = vadd.xlane.f32.xlu1 %v1974_v17  ;;  %v337_v15 = vadd.f32 %v1937_v0, %v1958_v32 }
 0x12c   :  { %v1041_v22 = vpop.f32.mrb[27].mxu1  ;;  %v1120_v23 = vpop.f32.mrb[26].mxu0 }
 0x12d   :  { %v1042_v27 = vadd.f32 %v1041_v22, %v1040_v7  ;;  %v1121_v28 = vpop.f32.mrb[27].mxu0  ;;  %v1979_v29 = vadd.f32 %v1119_v20, %v452_v21 }
 0x12e   :  { %v1122_v33 = vadd.f32 %v1121_v28, %v1120_v23 }
 0x12f   :  { %v457_v13 = vadd.f32 %v1042_v27, %v312_v26  ;;  %v1043_v34 = vpop.f32.mrb[28].mxu1  ;;  %663 = vadd.xlane.f32.xlu0 %v1979_v29  ;;  %v342_v27 = vadd.f32 %v1939_v6, %v1958_v32 }
 0x130   :  { %v1044_v35 = vpop.f32.mrb[29].mxu1  ;;  %v1123_v36 = vpop.f32.mrb[28].mxu0 }
 0x131   :  { %v1045_v38 = vadd.f32 %v1044_v35, %v1043_v34  ;;  %v1124_v39 = vpop.f32.mrb[29].mxu0  ;;  %v1984_v40 = vadd.f32 %v1122_v33, %v457_v13 }
 0x132   :  { %v1125_v41 = vadd.f32 %v1124_v39, %v1123_v36 }
 0x133   :  { %v462_v19 = vadd.f32 %v1045_v38, %v317_v37  ;;  %v1046_v42 = vpop.f32.mrb[30].mxu1  ;;  %665 = vadd.xlane.f32.xlu1 %v1984_v40  ;;  %v347_v38 = vadd.f32 %v1941_v12, %v1958_v32 }
 0x134   :  { %v1047_v43 = vpop.f32.mrb[31].mxu1  ;;  %v1126_v44 = vpop.f32.mrb[30].mxu0 }
 0x135   :  { %v1048_v46 = vadd.f32 %v1047_v43, %v1046_v42  ;;  %v1127_v48 = vpop.f32.mrb[31].mxu0  ;;  %v1989_v49 = vadd.f32 %v1125_v41, %v462_v19 }
 0x136   :  { %v1128_v50 = vadd.f32 %v1127_v48, %v1126_v44 }
 0x137   :  { %v467_v25 = vadd.f32 %v1048_v46, %v322_v45  ;;  %v1049_v51 = vpop.f32.mrb[32].mxu1  ;;  %667 = vadd.xlane.f32.xlu0 %v1989_v49  ;;  %v352_v46 = vadd.f32 %v1943_v18, %v1958_v32 }
 0x138   :  { %v1050_v53 = vpop.f32.mrb[33].mxu1  ;;  %v1129_v54 = vpop.f32.mrb[32].mxu0 }
 0x139   :  { %v1051_v56 = vadd.f32 %v1050_v53, %v1049_v51  ;;  %v1130_v60 = vpop.f32.mrb[33].mxu0  ;;  %v1994_v61 = vadd.f32 %v1128_v50, %v467_v25 }
 0x13a   :  { %v1131_v59 = vadd.f32 %v1130_v60, %v1129_v54 }
 0x13b   :  { %v472_v31 = vadd.f32 %v1051_v56, %v327_v55  ;;  %v1052_v62 = vpop.f32.mrb[34].mxu1  ;;  %669 = vadd.xlane.f32.xlu1 %v1994_v61  ;;  %v357_v56 = vadd.f32 %v1947_v24, %v1958_v32 }
 0x13c   :  { %v1053_v63 = vpop.f32.mrb[35].mxu1  ;;  %v1132_v2 = vpop.f32.mrb[34].mxu0 }
 0x13d   :  { %v1054_v4 = vadd.f32 %v1053_v63, %v1052_v62  ;;  %v1133_v8 = vpop.f32.mrb[35].mxu0  ;;  %v1999_v9 = vadd.f32 %v1131_v59, %v472_v31 }
 0x13e   :  { %v1134_v1 = vadd.f32 %v1133_v8, %v1132_v2 }
 0x13f   :  { %v477_v52 = vadd.f32 %v1054_v4, %v332_v3  ;;  %v1055_v10 = vpop.f32.mrb[36].mxu1  ;;  %671 = vadd.xlane.f32.xlu0 %v1999_v9  ;;  %v362_v4 = vadd.f32 %v1951_v30, %v1958_v32 }
 0x140   :  { %v1056_v11 = vpop.f32.mrb[37].mxu1  ;;  %v1135_v14 = vpop.f32.mrb[36].mxu0 }
 0x141   :  { %v1057_v16 = vadd.f32 %v1056_v11, %v1055_v10  ;;  %v1136_v20 = vpop.f32.mrb[37].mxu0  ;;  %v2004_v21 = vadd.f32 %v1134_v1, %v477_v52 }
 0x142   :  { %v1137_v7 = vadd.f32 %v1136_v20, %v1135_v14 }
 0x143   :  { %v482_v58 = vadd.f32 %v1057_v16, %v337_v15  ;;  %v1058_v22 = vpop.f32.mrb[38].mxu1  ;;  %673 = vadd.xlane.f32.xlu1 %v2004_v21 }
 0x144   :  { %v1059_v23 = vpop.f32.mrb[39].mxu1  ;;  %v1138_v26 = vpop.f32.mrb[38].mxu0 }
 0x145   :  { %v1060_v28 = vadd.f32 %v1059_v23, %v1058_v22  ;;  %v1139_v33 = vpop.f32.mrb[39].mxu0  ;;  %v2009_v13 = vadd.f32 %v1137_v7, %v482_v58 }
 0x146   :  { %v1140_v34 = vadd.f32 %v1139_v33, %v1138_v26 }
 0x147   :  { %v487_v0 = vadd.f32 %v1060_v28, %v342_v27  ;;  %v1061_v35 = vpop.f32.mrb[40].mxu1  ;;  %675 = vadd.xlane.f32.xlu0 %v2009_v13 }
 0x148   :  { %v1062_v36 = vpop.f32.mrb[41].mxu1  ;;  %v1141_v37 = vpop.f32.mrb[40].mxu0 }
 0x149   :  { %v1063_v39 = vadd.f32 %v1062_v36, %v1061_v35  ;;  %v1142_v41 = vpop.f32.mrb[41].mxu0  ;;  %v2014_v19 = vadd.f32 %v1140_v34, %v487_v0 }
 0x14a   :  { %v1143_v42 = vadd.f32 %v1142_v41, %v1141_v37 }
 0x14b   :  { %v492_v6 = vadd.f32 %v1063_v39, %v347_v38  ;;  %v1064_v43 = vpop.f32.mrb[42].mxu1  ;;  %677 = vadd.xlane.f32.xlu1 %v2014_v19 }
 0x14c   :  { %v1065_v44 = vpop.f32.mrb[43].mxu1  ;;  %v1144_v45 = vpop.f32.mrb[42].mxu0 }
 0x14d   :  { %v1066_v48 = vadd.f32 %v1065_v44, %v1064_v43  ;;  %v1145_v50 = vpop.f32.mrb[43].mxu0  ;;  %v2019_v25 = vadd.f32 %v1143_v42, %v492_v6 }
 0x14e   :  { %v1146_v51 = vadd.f32 %v1145_v50, %v1144_v45 }
 0x14f   :  { %v497_v12 = vadd.f32 %v1066_v48, %v352_v46  ;;  %v1067_v53 = vpop.f32.mrb[44].mxu1  ;;  %679 = vadd.xlane.f32.xlu0 %v2019_v25 }
 0x150   :  { %v1068_v54 = vpop.f32.mrb[45].mxu1  ;;  %v1147_v55 = vpop.f32.mrb[44].mxu0 }
 0x151   :  { %v1069_v60 = vadd.f32 %v1068_v54, %v1067_v53  ;;  %v1148_v59 = vpop.f32.mrb[45].mxu0  ;;  %v2024_v31 = vadd.f32 %v1146_v51, %v497_v12 }
 0x152   :  { %v1149_v62 = vadd.f32 %v1148_v59, %v1147_v55 }
 0x153   :  { %v502_v18 = vadd.f32 %v1069_v60, %v357_v56  ;;  %v1070_v63 = vpop.f32.mrb[46].mxu1  ;;  %681 = vadd.xlane.f32.xlu1 %v2024_v31 }
 0x154   :  { %v1071_v2 = vpop.f32.mrb[47].mxu1  ;;  %v1150_v3 = vpop.f32.mrb[46].mxu0 }
 0x155   :  { %v1072_v8 = vadd.f32 %v1071_v2, %v1070_v63  ;;  %v1151_v1 = vpop.f32.mrb[47].mxu0  ;;  %v2029_v52 = vadd.f32 %v1149_v62, %v502_v18 }
 0x156   :  { %v1152_v10 = vadd.f32 %v1151_v1, %v1150_v3 }
 0x157   :  { %v507_v24 = vadd.f32 %v1072_v8, %v362_v4  ;;  %683 = vadd.xlane.f32.xlu0 %v2029_v52 }
 0x159   :  { %v2032_v11 = vadd.f32 %v1152_v10, %v507_v24 }
 0x15b   :  { %685 = vadd.xlane.f32.xlu1 %v2032_v11 }
 0x1ac   :  { %v656_v14 = vpop.xlane.xlu0 %655 }
 0x1ad   :  { %v688_v15 = vmul.f32 0.0078125, %v656_v14 }
 0x1af   :  { %v2036_v16 = vsub.f32 %v1962_v47, %v688_v15 }
 0x1b0   :  { %v658_v20 = vpop.xlane.xlu0 %657 }
 0x1b1   :  { %v689_v7 = vmul.f32 0.0078125, %v658_v20  ;;  %v720_v30 = vmul.f32 %v2036_v16, %v2036_v16 }
 0x1b3   :  { %v2041_v32 = vsub.f32 %v1966_v57, %v689_v7  ;;  %736 = vadd.xlane.f32.xlu0 %v720_v30 }
 0x1b4   :  { %v660_v58 = vpop.xlane.xlu1 %659 }
 0x1b5   :  { %v690_v22 = vmul.f32 0.0078125, %v660_v58  ;;  %v721_v23 = vmul.f32 %v2041_v32, %v2041_v32 }
 0x1b7   :  { %v2046_v26 = vsub.f32 %v1970_v5, %v690_v22  ;;  %738 = vadd.xlane.f32.xlu1 %v721_v23 }
 0x1b8   :  { %v662_v47 = vpop.xlane.xlu1 %661 }
 0x1b9   :  { %v691_v27 = vmul.f32 0.0078125, %v662_v47  ;;  %v722_v28 = vmul.f32 %v2046_v26, %v2046_v26 }
 0x1bb   :  { %v2051_v33 = vsub.f32 %v1974_v17, %v691_v27  ;;  %740 = vadd.xlane.f32.xlu0 %v722_v28 }
 0x1bc   :  { %v664_v57 = vpop.xlane.xlu0 %663 }
 0x1bd   :  { %v692_v34 = vmul.f32 0.0078125, %v664_v57  ;;  %v723_v0 = vmul.f32 %v2051_v33, %v2051_v33 }
 0x1bf   :  { %v2056_v35 = vsub.f32 %v1979_v29, %v692_v34  ;;  %742 = vadd.xlane.f32.xlu1 %v723_v0  ;;  %v2118_v34 = vld [vmem:[%s2188_s3] ss:$0 sm:$0xff]  ;;  %s1324_s3 = smov [#allocation2]  }
 0x1c0   :  { %v666_v5 = vpop.xlane.xlu1 %665 }
 0x1c1   :  { %v693_v36 = vmul.f32 0.0078125, %v666_v5  ;;  %v724_v37 = vmul.f32 %v2056_v35, %v2056_v35 }
 0x1c3   :  { %v2061_v38 = vsub.f32 %v1984_v40, %v693_v36  ;;  %744 = vadd.xlane.f32.xlu0 %v724_v37  ;;  %v2124_v37 = vld [vmem:[%s2189_s4] ss:$0 sm:$0xff]  ;;  %s899_s4 = sshll.u32 %s1324_s3, 4  ;;  %s900_s4 = int_to_ptr.vmem [resolvable:$true] %s899_s4 }
 0x1c4   :  { %v668_v17 = vpop.xlane.xlu0 %667  ;;  %s1300_s25 = scalar_lea.vmem %s900_s4, 2048  ;;  %p1305_p1 = scmp.lt.s32.totalorder %s900_s4, %s900_s4 }
 0x1c5   :  { %v694_v39 = vmul.f32 0.0078125, %v668_v17  ;;  %v725_v41 = vmul.f32 %v2061_v38, %v2061_v38  ;;  %p1301_p0 = scmp.ne.s32.totalorder %s900_s4, %s1300_s25  ;;  %p1306_p2 = scmp.lt.s32.totalorder %s1300_s25, %s1300_s25 }
 0x1c7   :  { %v2066_v42 = vsub.f32 %v1989_v49, %v694_v39  ;;  %746 = vadd.xlane.f32.xlu1 %v725_v41  ;;  %p1307_p3 = por %p1306_p2, %p1305_p1 }
 0x1c8   :  { %v670_v29 = vpop.xlane.xlu1 %669 }
 0x1c9   :  { %v695_v6 = vmul.f32 0.0078125, %v670_v29  ;;  %v726_v43 = vmul.f32 %v2066_v42, %v2066_v42  ;;  %p1308_p4 = pnand %p1307_p3, %p1301_p0 }
 0x1cb   :  { %v2071_v44 = vsub.f32 %v1994_v61, %v695_v6  ;;  %748 = vadd.xlane.f32.xlu0 %v726_v43 }
 0x1cc   :  { %v672_v40 = vpop.xlane.xlu0 %671 }
 0x1cd   :  { %v696_v45 = vmul.f32 0.0078125, %v672_v40  ;;  %v727_v46 = vmul.f32 %v2071_v44, %v2071_v44 }
 0x1cf   :  { %v2076_v48 = vsub.f32 %v1999_v9, %v696_v45  ;;  %750 = vadd.xlane.f32.xlu1 %v727_v46 }
 0x1d0   :  { %v674_v49 = vpop.xlane.xlu1 %673 }
 0x1d1   :  { %v697_v50 = vmul.f32 0.0078125, %v674_v49  ;;  %v728_v51 = vmul.f32 %v2076_v48, %v2076_v48 }
 0x1d3   :  { %v2081_v12 = vsub.f32 %v2004_v21, %v697_v50  ;;  %752 = vadd.xlane.f32.xlu0 %v728_v51 }
 0x1d4   :  { %v676_v61 = vpop.xlane.xlu0 %675 }
 0x1d5   :  { %v698_v53 = vmul.f32 0.0078125, %v676_v61  ;;  %v729_v54 = vmul.f32 %v2081_v12, %v2081_v12 }
 0x1d7   :  { %v2086_v55 = vsub.f32 %v2009_v13, %v698_v53  ;;  %754 = vadd.xlane.f32.xlu1 %v729_v54 }
 0x1d8   :  { %v678_v9 = vpop.xlane.xlu1 %677 }
 0x1d9   :  { %v699_v56 = vmul.f32 0.0078125, %v678_v9  ;;  %v730_v60 = vmul.f32 %v2086_v55, %v2086_v55 }
 0x1db   :  { %v2091_v59 = vsub.f32 %v2014_v19, %v699_v56  ;;  %756 = vadd.xlane.f32.xlu0 %v730_v60 }
 0x1dc   :  { %v680_v21 = vpop.xlane.xlu0 %679 }
 0x1dd   :  { %v700_v62 = vmul.f32 0.0078125, %v680_v21  ;;  %v731_v18 = vmul.f32 %v2091_v59, %v2091_v59 }
 0x1df   :  { %v2096_v63 = vsub.f32 %v2019_v25, %v700_v62  ;;  %758 = vadd.xlane.f32.xlu1 %v731_v18 }
 0x1e0   :  { %v682_v13 = vpop.xlane.xlu1 %681 }
 0x1e1   :  { %v701_v2 = vmul.f32 0.0078125, %v682_v13  ;;  %v732_v3 = vmul.f32 %v2096_v63, %v2096_v63 }
 0x1e3   :  { %v2101_v4 = vsub.f32 %v2024_v31, %v701_v2  ;;  %760 = vadd.xlane.f32.xlu0 %v732_v3 }
 0x1e4   :  { %v684_v19 = vpop.xlane.xlu0 %683 }
 0x1e5   :  { %v702_v8 = vmul.f32 0.0078125, %v684_v19  ;;  %v733_v1 = vmul.f32 %v2101_v4, %v2101_v4 }
 0x1e7   :  { %v2106_v10 = vsub.f32 %v2029_v52, %v702_v8  ;;  %762 = vadd.xlane.f32.xlu1 %v733_v1 }
 0x1e8   :  { %v686_v25 = vpop.xlane.xlu1 %685 }
 0x1e9   :  { %v703_v24 = vmul.f32 0.0078125, %v686_v25  ;;  %v734_v14 = vmul.f32 %v2106_v10, %v2106_v10 }
 0x1eb   :  { %v2111_v15 = vsub.f32 %v2032_v11, %v703_v24  ;;  %764 = vadd.xlane.f32.xlu0 %v734_v14 }
 0x1ed   :  { %v735_v31 = vmul.f32 %v2111_v15, %v2111_v15 }
 0x1ef   :  { %766 = vadd.xlane.f32.xlu1 %v735_v31 }
 0x240   :  { %v737_v20 = vpop.xlane.xlu0 %736 }
 0x241   :  { %v768_v7 = vmul.f32 0.0078125, %v737_v20 }
 0x243   :  { %v784_v30 = vadd.f32 1e-05, %v768_v7 }
 0x244   :  { %v739_v58 = vpop.xlane.xlu1 %738 }
 0x245   :  { %1268 = vrsqrt.f32 %v784_v30  ;;  %v769_v52 = vmul.f32 0.0078125, %v739_v58 }
 0x247   :  { %v785_v22 = vadd.f32 1e-05, %v769_v52 }
 0x248   :  { %v741_v23 = vpop.xlane.xlu0 %740 }
 0x249   :  { %1270 = vrsqrt.f32 %v785_v22  ;;  %v770_v47 = vmul.f32 0.0078125, %v741_v23 }
 0x24b   :  { %v786_v27 = vadd.f32 1e-05, %v770_v47 }
 0x24c   :  { %v743_v28 = vpop.xlane.xlu1 %742 }
 0x24d   :  { %1272 = vrsqrt.f32 %v786_v27  ;;  %v771_v11 = vmul.f32 0.0078125, %v743_v28 }
 0x24f   :  { %v1269_v57 = vpop.eup %1268  ;;  %v787_v0 = vadd.f32 1e-05, %v771_v11 }
 0x250   :  { %v816_v5 = vmul.f32 %v1269_v57, %v2036_v16  ;;  %v745_v36 = vpop.xlane.xlu0 %744 }
 0x251   :  { %1274 = vrsqrt.f32 %v787_v0  ;;  %v772_v17 = vmul.f32 0.0078125, %v745_v36 }
 0x252   :  { %v839_v39 = vmul.f32 %v2118_v34, %v816_v5 }
 0x253   :  { %v1271_v41 = vpop.eup %1270  ;;  %v788_v29 = vadd.f32 1e-05, %v772_v17 }
 0x254   :  { %v862_v6 = vadd.f32 %v2124_v37, %v839_v39  ;;  %v817_v43 = vmul.f32 %v1271_v41, %v2041_v32  ;;  %v747_v40 = vpop.xlane.xlu1 %746 }
 0x255   :  { %1276 = vrsqrt.f32 %v788_v29  ;;  %v773_v45 = vmul.f32 0.0078125, %v747_v40 }
 0x256   :  { %878 = vst [vmem:[#allocation2] sm:$0xff] %v862_v6  ;;  %v840_v16 = vmul.f32 %v2118_v34, %v817_v43 }
 0x257   :  { %v1273_v46 = vpop.eup %1272  ;;  %v789_v49 = vadd.f32 1e-05, %v773_v45 }
 0x258   :  { %v863_v50 = vadd.f32 %v2124_v37, %v840_v16  ;;  %v818_v51 = vmul.f32 %v1273_v46, %v2046_v26  ;;  %v749_v61 = vpop.xlane.xlu0 %748 }
 0x259   :  { %1278 = vrsqrt.f32 %v789_v49  ;;  %v774_v53 = vmul.f32 0.0078125, %v749_v61 }
 0x25a   :  { %879 = vst [vmem:[#allocation2 + $0x8] sm:$0xff] %v863_v50  ;;  %v841_v54 = vmul.f32 %v2118_v34, %v818_v51 }
 0x25b   :  { %v1275_v9 = vpop.eup %1274  ;;  %v790_v32 = vadd.f32 1e-05, %v774_v53 }
 0x25c   :  { %v864_v56 = vadd.f32 %v2124_v37, %v841_v54  ;;  %v819_v60 = vmul.f32 %v1275_v9, %v2051_v33  ;;  %v751_v21 = vpop.xlane.xlu1 %750 }
 0x25d   :  { %1280 = vrsqrt.f32 %v790_v32  ;;  %v775_v62 = vmul.f32 0.0078125, %v751_v21 }
 0x25e   :  { %880 = vst [vmem:[#allocation2 + $0x10] sm:$0xff] %v864_v56  ;;  %v842_v18 = vmul.f32 %v2118_v34, %v819_v60 }
 0x25f   :  { %v1277_v13 = vpop.eup %1276  ;;  %v791_v26 = vadd.f32 1e-05, %v775_v62 }
 0x260   :  { %v865_v2 = vadd.f32 %v2124_v37, %v842_v18  ;;  %v820_v3 = vmul.f32 %v1277_v13, %v2056_v35  ;;  %v753_v19 = vpop.xlane.xlu0 %752 }
 0x261   :  { %1282 = vrsqrt.f32 %v791_v26  ;;  %v776_v8 = vmul.f32 0.0078125, %v753_v19 }
 0x262   :  { %881 = vst [vmem:[#allocation2 + $0x18] sm:$0xff] %v865_v2  ;;  %v843_v1 = vmul.f32 %v2118_v34, %v820_v3 }
 0x263   :  { %v1279_v25 = vpop.eup %1278  ;;  %v792_v33 = vadd.f32 1e-05, %v776_v8 }
 0x264   :  { %v866_v24 = vadd.f32 %v2124_v37, %v843_v1  ;;  %v821_v14 = vmul.f32 %v1279_v25, %v2061_v38  ;;  %v755_v31 = vpop.xlane.xlu1 %754 }
 0x265   :  { %1284 = vrsqrt.f32 %v792_v33  ;;  %v777_v20 = vmul.f32 0.0078125, %v755_v31 }
 0x266   :  { %882 = vst [vmem:[#allocation2 + $0x20] sm:$0xff] %v866_v24  ;;  %v844_v7 = vmul.f32 %v2118_v34, %v821_v14 }
 0x267   :  { %v1281_v30 = vpop.eup %1280  ;;  %v793_v35 = vadd.f32 1e-05, %v777_v20 }
 0x268   :  { %v867_v58 = vadd.f32 %v2124_v37, %v844_v7  ;;  %v822_v52 = vmul.f32 %v1281_v30, %v2066_v42  ;;  %v757_v22 = vpop.xlane.xlu0 %756 }
 0x269   :  { %1286 = vrsqrt.f32 %v793_v35  ;;  %v778_v23 = vmul.f32 0.0078125, %v757_v22 }
 0x26a   :  { %883 = vst [vmem:[#allocation2 + $0x28] sm:$0xff] %v867_v58  ;;  %v845_v47 = vmul.f32 %v2118_v34, %v822_v52 }
 0x26b   :  { %v1283_v27 = vpop.eup %1282  ;;  %v794_v38 = vadd.f32 1e-05, %v778_v23 }
 0x26c   :  { %v868_v28 = vadd.f32 %v2124_v37, %v845_v47  ;;  %v823_v11 = vmul.f32 %v1283_v27, %v2071_v44  ;;  %v759_v57 = vpop.xlane.xlu1 %758 }
 0x26d   :  { %1288 = vrsqrt.f32 %v794_v38  ;;  %v779_v0 = vmul.f32 0.0078125, %v759_v57 }
 0x26e   :  { %884 = vst [vmem:[#allocation2 + $0x30] sm:$0xff] %v868_v28  ;;  %v846_v5 = vmul.f32 %v2118_v34, %v823_v11 }
 0x26f   :  { %v1285_v36 = vpop.eup %1284  ;;  %v795_v42 = vadd.f32 1e-05, %v779_v0 }
 0x270   :  { %v869_v17 = vadd.f32 %v2124_v37, %v846_v5  ;;  %v824_v39 = vmul.f32 %v1285_v36, %v2076_v48  ;;  %v761_v41 = vpop.xlane.xlu0 %760 }
 0x271   :  { %1290 = vrsqrt.f32 %v795_v42  ;;  %v780_v29 = vmul.f32 0.0078125, %v761_v41 }
 0x272   :  { %885 = vst [vmem:[#allocation2 + $0x38] sm:$0xff] %v869_v17  ;;  %v847_v6 = vmul.f32 %v2118_v34, %v824_v39 }
 0x273   :  { %v1287_v43 = vpop.eup %1286  ;;  %v796_v44 = vadd.f32 1e-05, %v780_v29 }
 0x274   :  { %v870_v40 = vadd.f32 %v2124_v37, %v847_v6  ;;  %v825_v45 = vmul.f32 %v1287_v43, %v2081_v12  ;;  %v763_v16 = vpop.xlane.xlu1 %762 }
 0x275   :  { %1292 = vrsqrt.f32 %v796_v44  ;;  %v781_v46 = vmul.f32 0.0078125, %v763_v16 }
 0x276   :  { %886 = vst [vmem:[#allocation2 + $0x40] sm:$0xff] %v870_v40  ;;  %v848_v49 = vmul.f32 %v2118_v34, %v825_v45 }
 0x277   :  { %v1289_v50 = vpop.eup %1288  ;;  %v797_v48 = vadd.f32 1e-05, %v781_v46 }
 0x278   :  { %v871_v51 = vadd.f32 %v2124_v37, %v848_v49  ;;  %v826_v61 = vmul.f32 %v1289_v50, %v2086_v55  ;;  %v765_v53 = vpop.xlane.xlu0 %764 }
 0x279   :  { %1294 = vrsqrt.f32 %v797_v48  ;;  %v782_v54 = vmul.f32 0.0078125, %v765_v53 }
 0x27a   :  { %887 = vst [vmem:[#allocation2 + $0x48] sm:$0xff] %v871_v51  ;;  %v849_v9 = vmul.f32 %v2118_v34, %v826_v61 }
 0x27b   :  { %v1291_v32 = vpop.eup %1290  ;;  %v798_v12 = vadd.f32 1e-05, %v782_v54 }
 0x27c   :  { %v872_v56 = vadd.f32 %v2124_v37, %v849_v9  ;;  %v827_v60 = vmul.f32 %v1291_v32, %v2091_v59  ;;  %v767_v21 = vpop.xlane.xlu1 %766 }
 0x27d   :  { %1296 = vrsqrt.f32 %v798_v12  ;;  %v783_v62 = vmul.f32 0.0078125, %v767_v21 }
 0x27e   :  { %888 = vst [vmem:[#allocation2 + $0x50] sm:$0xff] %v872_v56  ;;  %v850_v18 = vmul.f32 %v2118_v34, %v827_v60 }
 0x27f   :  { %v1293_v13 = vpop.eup %1292  ;;  %v799_v55 = vadd.f32 1e-05, %v783_v62 }
 0x280   :  { %v873_v26 = vadd.f32 %v2124_v37, %v850_v18  ;;  %v828_v2 = vmul.f32 %v1293_v13, %v2096_v63 }
 0x281   :  { %1298 = vrsqrt.f32 %v799_v55 }
 0x282   :  { %889 = vst [vmem:[#allocation2 + $0x58] sm:$0xff] %v873_v26  ;;  %v851_v3 = vmul.f32 %v2118_v34, %v828_v2 }
 0x283   :  { %v1295_v19 = vpop.eup %1294 }
 0x284   :  { %v874_v8 = vadd.f32 %v2124_v37, %v851_v3  ;;  %v829_v59 = vmul.f32 %v1295_v19, %v2101_v4 }
 0x286   :  { %890 = vst [vmem:[#allocation2 + $0x60] sm:$0xff] %v874_v8  ;;  %v852_v1 = vmul.f32 %v2118_v34, %v829_v59 }
 0x287   :  { %v1297_v25 = vpop.eup %1296 }
 0x288   :  { %v875_v33 = vadd.f32 %v2124_v37, %v852_v1  ;;  %v830_v24 = vmul.f32 %v1297_v25, %v2106_v10 }
 0x28a   :  { %891 = vst [vmem:[#allocation2 + $0x68] sm:$0xff] %v875_v33  ;;  %v853_v63 = vmul.f32 %v2118_v34, %v830_v24 }
 0x28b   :  { %v1299_v14 = vpop.eup %1298 }
 0x28c   :  { %v876_v31 = vadd.f32 %v2124_v37, %v853_v63  ;;  %v831_v20 = vmul.f32 %v1299_v14, %v2111_v15 }
 0x28e   :  { %892 = vst [vmem:[#allocation2 + $0x70] sm:$0xff] %v876_v31  ;;  %v854_v4 = vmul.f32 %v2118_v34, %v831_v20 }
 0x290   :  { %v877_v7 = vadd.f32 %v2124_v37, %v854_v4 }
 0x292   :  { %893 = vst [vmem:[#allocation2 + $0x78] sm:$0xff] %v877_v7 }
 0x293   :  { %1311 = shalt.err (!%p1308_p4)
}
 0x294   :  { %s1312_s28 = scalar_lea.hbm %s2190_s5, 2048 }
 0x295   :  { %p1313_p5 = scmp.ne.s32.totalorder %s2190_s5, %s1312_s28  ;;  %p1316_p6 = scmp.lt.u32.totalorder %s1312_s28, %s2190_s5 }
 0x297   :  { %p1318_p7 = pnand %p1316_p6, %p1313_p5 }
 0x299   :  { %1321 = shalt.err (!%p1318_p7)
}
 0x29a   :  { %s1325_s8 = smov 128   ;;  %s1326_s9 = smov 8  }
 0x29b   :  { %905 = dma.vmem_to_hbm [thread:$0]  %s900_s4, 2048, %s2190_s5, [#allocation3], %s1325_s8, %s1325_s8, %s1326_s9  }
 0x29c   :  { %1322 = dma.done.wait [#allocation3], 2048  }
 0x29d   :  { %1323 = vsyncadd [#allocation3], 4294965248 }
 0x29e   :  { %909 = vsyncpa [#allocation3], 1 }

</bundles_post_ra>
